<compile_context>
chip_gen: v7x
topology: tpu7x:2x2x1
jax: 0.10.0
libtpu: 0.0.40
codegen_flags: <defaults>
</compile_context>

<pallas_src>
import math
import functools

import numpy as np
import jax
import jax.numpy as jnp
from jax.experimental import pallas as pl
from jax.experimental.pallas import tpu as pltpu

# ---------------- config (small, consistent with the module) ----------------
B = 2            # batch
K = 4            # latent_channels
L = 16           # latent_dim
D = K * L        # flattened latent features (64)
H = 128          # hidden width of the synthetic diff_LDM
TEMB = 32        # time_embedding_dim
DT = D + TEMB    # fused first-layer input width (96)
NUM_STEPS = 50
BETA_START = 1e-4
BETA_END = 0.5
SCHEDULE = "quad"

SLAB_W = 2 * DT + D   # 256 lanes: [sa*x | temb] + [sb*noise | 0] + [noise]


# ---------------- diffusion schedule (host constant, mirrors __init__) ----------------
def make_schedule():
    if SCHEDULE == "quad":
        beta = np.linspace(BETA_START ** 0.5, BETA_END ** 0.5, NUM_STEPS) ** 2
    else:  # 'linear'
        beta = np.linspace(BETA_START, BETA_END, NUM_STEPS)
    alpha_hat = 1.0 - beta
    alpha = np.cumprod(alpha_hat)
    return jnp.asarray(alpha, jnp.float32)


ALPHA = make_schedule()   # (NUM_STEPS,)  == self.alpha


# ---------------- sinusoidal time embedding (glue, runs under jit) ----------------
def time_embedding(t, d):
    pos = t.astype(jnp.float32)[:, None]                               # (B, 1)
    div = 1.0 / jnp.power(10000.0, jnp.arange(0, d, 2, dtype=jnp.float32) / d)
    pe = jnp.zeros((t.shape[0], d), jnp.float32)
    pe = pe.at[:, 0::2].set(jnp.sin(pos * div))
    pe = pe.at[:, 1::2].set(jnp.cos(pos * div))
    return pe


# ---------------- fused Pallas kernel ----------------
def ldm_loss_kernel(slab_ref, w_in_ref, w2_ref, bias_ref, loss_ref):
    # slab: (B, 256) f32 = [ sqrt(a)*x , temb | sqrt(1-a)*noise , 0 | noise ]
    slab = slab_ref[...]

    # noising fused with time-embedding concat: one VPU add builds the
    # first-layer operand [noisy | temb]  (noisy = sqrt(a)*x + sqrt(1-a)*noise)
    operand = slab[:, :DT] + slab[:, DT:2 * DT]        # (B, 96) f32
    noise = slab[:, 2 * DT:2 * DT + D]                 # (B, 64) f32

    b1 = bias_ref[:, :H]                               # (1, H)
    b2 = bias_ref[:, H:H + D]                          # (1, D)

    # synthetic diff_LDM: single fused input matmul (bf16 operands, f32 accumulate)
    h = jnp.dot(operand.astype(jnp.bfloat16), w_in_ref[...],
                preferred_element_type=jnp.float32) + b1
    h = h * jax.nn.sigmoid(h)                          # SiLU in f32 (EUP)
    pred = jnp.dot(h.astype(jnp.bfloat16), w2_ref[...],
                   preferred_element_type=jnp.float32) + b2

    # mse_loss(predicted, noise): full reduction, scalar written to SMEM
    diff = pred - noise
    loss_ref[0, 0] = jnp.sum(diff * diff) * (1.0 / float(B * D))


def _ldm_loss_call(slab, w_in, w2, bias):
    out = pl.pallas_call(
        ldm_loss_kernel,
        out_shape=jax.ShapeDtypeStruct((1, 1), jnp.float32),
        in_specs=[pl.BlockSpec(memory_space=pltpu.MemorySpace.VMEM)] * 4,
        out_specs=pl.BlockSpec(memory_space=pltpu.MemorySpace.SMEM),
    )(slab, w_in, w2, bias)
    return out[0, 0]


# ---------------- jitted end-to-end forward (glue + kernel in one dispatch) ----------------
@functools.partial(jax.jit, static_argnums=())
def ldm_forward(observed_data, t, noise, w_in, w2, bias):
    x = observed_data.reshape(B, D)
    n = noise.reshape(B, D)

    current_alpha = ALPHA[t][:, None]                  # (B, 1) == alpha_torch[t]
    sa = jnp.sqrt(current_alpha)
    sb = jnp.sqrt(1.0 - current_alpha)

    temb = time_embedding(t, TEMB)                     # (B, TEMB)

    # pack a single lane-dense activation slab (B, 256); all scaling folded here
    piece0 = jnp.concatenate([sa * x, temb], axis=1)                               # (B, 96)
    piece1 = jnp.concatenate([sb * n, jnp.zeros((B, TEMB), jnp.float32)], axis=1)  # (B, 96)
    slab = jnp.concatenate([piece0, piece1, n], axis=1)                            # (B, 256)

    return _ldm_loss_call(slab, w_in, w2, bias)


# ---------------- deterministic parameter init ----------------
def init_params(key):
    k1, k2, k3 = jax.random.split(key, 3)
    w1 = jax.random.normal(k1, (D, H), jnp.float32) * (1.0 / math.sqrt(D))
    wt = jax.random.normal(k2, (TEMB, H), jnp.float32) * (1.0 / math.sqrt(TEMB))
    w2 = jax.random.normal(k3, (H, D), jnp.float32) * (1.0 / math.sqrt(H))
    b1 = jnp.zeros((1, H), jnp.float32)
    b2 = jnp.zeros((1, D), jnp.float32)

    w_in = jnp.concatenate([w1, wt], axis=0).astype(jnp.bfloat16)   # (D+TEMB, H)
    w2_b = w2.astype(jnp.bfloat16)                                  # (H, D)
    bias = jnp.concatenate([b1, b2], axis=1)                        # (1, H+D) f32
    return w_in, w2_b, bias


if __name__ == "__main__":
    key = jax.random.PRNGKey(0)
    k_data, k_t, k_noise, k_params = jax.random.split(key, 4)

    # observed_data: (B, K, L) == batch.to(device).float()
    observed_data = jax.random.normal(k_data, (B, K, L), jnp.float32)

    # t = torch.randint(0, num_steps, [B]); noise = torch.randn_like(observed_data)
    t = jax.random.randint(k_t, (B,), 0, NUM_STEPS)
    noise = jax.random.normal(k_noise, (B, K, L), jnp.float32)

    w_in, w2, bias = init_params(k_params)

    loss = ldm_forward(observed_data, t, noise, w_in, w2, bias)
    loss = jax.block_until_ready(loss)
    assert loss.shape == () and bool(jnp.isfinite(loss))
    print("KERNEL_OK")
</pallas_src>

<mosaic_0001>
module attributes {stable_mosaic.version = 11 : i64} {
  func.func @ldm_loss_kernel(%arg0: memref<2x256xf32, #tpu.memory_space<vmem>>, %arg1: memref<96x128xbf16, #tpu.memory_space<vmem>>, %arg2: memref<128x64xbf16, #tpu.memory_space<vmem>>, %arg3: memref<1x192xf32, #tpu.memory_space<vmem>>, %arg4: memref<1x1xf32, #tpu.memory_space<smem>>) attributes {dimension_semantics = [], scalar_prefetch = 0 : i64, scratch_operands = 0 : i64, tpu.core_type = #tpu.core_type<tc>} {
    %c0 = arith.constant 0 : index
    %c0_0 = arith.constant 0 : index
    %0 = vector.load %arg0[%c0, %c0_0] : memref<2x256xf32, #tpu.memory_space<vmem>>, vector<2x256xf32>
    %1 = vector.extract_strided_slice %0 {offsets = [0, 0], sizes = [2, 96], strides = [1, 1]} : vector<2x256xf32> to vector<2x96xf32>
    %2 = vector.extract_strided_slice %0 {offsets = [0, 96], sizes = [2, 96], strides = [1, 1]} : vector<2x256xf32> to vector<2x96xf32>
    %3 = arith.addf %1, %2 : vector<2x96xf32>
    %4 = vector.extract_strided_slice %0 {offsets = [0, 192], sizes = [2, 64], strides = [1, 1]} : vector<2x256xf32> to vector<2x64xf32>
    %c0_1 = arith.constant 0 : index
    %c0_2 = arith.constant 0 : index
    %5 = vector.load %arg3[%c0_1, %c0_2] : memref<1x192xf32, #tpu.memory_space<vmem>>, vector<1x128xf32>
    %c0_3 = arith.constant 0 : index
    %c128 = arith.constant 128 : index
    %6 = vector.load %arg3[%c0_3, %c128] : memref<1x192xf32, #tpu.memory_space<vmem>>, vector<1x64xf32>
    %7 = arith.truncf %3 : vector<2x96xf32> to vector<2x96xbf16>
    %c0_4 = arith.constant 0 : index
    %c0_5 = arith.constant 0 : index
    %8 = vector.load %arg1[%c0_4, %c0_5] : memref<96x128xbf16, #tpu.memory_space<vmem>>, vector<96x128xbf16>
    %cst = arith.constant dense<0.000000e+00> : vector<2x128xf32>
    %9 = tpu.matmul %7, %8, %cst {dimension_numbers = #tpu.dot_dimension_numbers<[1], [0], [0], [1], [0, 0, 1, 1], [], []>} : vector<2x96xbf16>, vector<96x128xbf16>, vector<2x128xf32> -> vector<2x128xf32>
    %10 = vector.broadcast %5 : vector<1x128xf32> to vector<2x128xf32>
    %11 = arith.addf %9, %10 : vector<2x128xf32>
    %12 = arith.negf %11 : vector<2x128xf32>
    %13 = math.exp %12 : vector<2x128xf32>
    %cst_6 = arith.constant 1.000000e+00 : f32
    %14 = vector.broadcast %cst_6 : f32 to vector<2x128xf32>
    %15 = arith.addf %14, %13 : vector<2x128xf32>
    %16 = arith.divf %14, %15 : vector<2x128xf32>
    %17 = arith.mulf %11, %16 : vector<2x128xf32>
    %18 = arith.truncf %17 : vector<2x128xf32> to vector<2x128xbf16>
    %c0_7 = arith.constant 0 : index
    %c0_8 = arith.constant 0 : index
    %19 = vector.load %arg2[%c0_7, %c0_8] : memref<128x64xbf16, #tpu.memory_space<vmem>>, vector<128x64xbf16>
    %cst_9 = arith.constant dense<0.000000e+00> : vector<2x64xf32>
    %20 = tpu.matmul %18, %19, %cst_9 {dimension_numbers = #tpu.dot_dimension_numbers<[1], [0], [0], [1], [0, 0, 1, 1], [], []>} : vector<2x128xbf16>, vector<128x64xbf16>, vector<2x64xf32> -> vector<2x64xf32>
    %21 = vector.broadcast %6 : vector<1x64xf32> to vector<2x64xf32>
    %22 = arith.addf %20, %21 : vector<2x64xf32>
    %23 = arith.subf %22, %4 : vector<2x64xf32>
    %24 = arith.mulf %23, %23 : vector<2x64xf32>
    %25 = vector.shape_cast %24 : vector<2x64xf32> to vector<1x2x64xf32>
    %cst_10 = arith.constant dense<0.000000e+00> : vector<1xf32>
    %26 = vector.multi_reduction <add>, %25, %cst_10 [1, 2] : vector<1x2x64xf32> to vector<1xf32>
    %27 = vector.shape_cast %26 : vector<1xf32> to vector<1x1x1xf32>
    %28 = vector.extract %27[0, 0, 0] : f32 from vector<1x1x1xf32>
    %cst_11 = arith.constant 7.812500e-03 : f32
    %29 = arith.mulf %28, %cst_11 : f32
    %c0_12 = arith.constant 0 : index
    %c0_13 = arith.constant 0 : index
    %30 = memref.load %arg4[%c0_12, %c0_13] : memref<1x1xf32, #tpu.memory_space<smem>>
    memref.store %29, %arg4[%c0_12, %c0_13] : memref<1x1xf32, #tpu.memory_space<smem>>
    return
  }
}

</mosaic_0001>

<bundles_post_ra>
// kernel: ldm_forward.1
= control target key start
LH: loop header
LB: loop body
LE: loop exit
PB: predicated region body
PF: predicated region fallthrough
CT: control target
= control target key end

     0   :  { %s395_s17 = smov 32   ;;  %v396_v1 = vmov 0.0   ;;  %vm397_vm0 = vmmov 0   ;;  %s494_s0 = inlined_call_operand.vmem [shape: f32[2,256], index: 0, kind: input, shape index: {}]   ;;  %s495_s1 = inlined_call_operand.vmem [shape: bf16[96,128], index: 1, kind: input, shape index: {}]   ;;  %s496_s2 = inlined_call_operand.vmem [shape: bf16[128,64], index: 2, kind: input, shape index: {}]   ;;  %s497_s3 = inlined_call_operand.vmem [shape: f32[1,192], index: 3, kind: input, shape index: {}]   ;;  %s498_s4 = inlined_call_operand.hbm [shape: f32[1,1], index: 4, kind: output, shape index: {}]  }
   0x1   :  { %v429_v0 = vld [vmem:[%s494_s0] sm:$0xf]  ;;  %321 = vmatprep.subr.bf16.mxu0 %v396_v1  ;;  %337 = vmatprep.subr.bf16.mxu1 %v396_v1  ;;  %v366_v3 = vld [vmem:[%s495_s1 + $0x8] sm:$0xff]   ;;  %v367_v4 = vld [vmem:[%s495_s1 + $0x10] sm:$0xff]  }
   0x2   :  { %21 = vrot.lane.b32.xlu0 %v429_v0, %s395_s17  ;;  %v365_v2 = vld [vmem:[%s495_s1] sm:$0xff]   ;;  %333 = vmatprep.mubr.msk.bf16.mxu0 %vm397_vm0, %v396_v1  ;;  %v368_v5 = vld [vmem:[%s495_s1 + $0x18] sm:$0xff]  }
   0x3   :  { %322 = vmatpush3.bf16.msra.mxu0 %v365_v2  ;;  %353 = vmatprep.mubr.msk.bf16.mxu1 %vm397_vm0, %v396_v1 }
   0x4   :  { %323 = vmatprep.subr.bf16.mxu0 %v396_v1 }
   0x7   :  { %324 = vmatpush3.bf16.msra.mxu0 %v366_v3 }
   0x8   :  { %325 = vmatprep.subr.bf16.mxu0 %v396_v1 }
   0xb   :  { %326 = vmatpush3.bf16.msra.mxu0 %v367_v4 }
   0xc   :  { %327 = vmatprep.subr.bf16.mxu0 %v396_v1 }
   0xd   :  { %9 = vsyncpa [#allocation3], 0  ;;  %v369_v6 = vld [vmem:[%s495_s1 + $0x20] sm:$0xff]   ;;  %v370_v7 = vld [vmem:[%s495_s1 + $0x28] sm:$0xff]   ;;  %vm24_vm1 = vcmask 261120   ;;  %vm85_vm2 = vcmask 785408   ;;  %v250_v20 = vlaneseq }
   0xe   :  { %v371_v13 = vld [vmem:[%s496_s2] sm:$0xff]   ;;  %v372_v14 = vld [vmem:[%s496_s2 + $0x8] sm:$0xff]   ;;  %v373_v15 = vld [vmem:[%s496_s2 + $0x10] sm:$0xff]   ;;  %v398_v18 = vmov 1983009808   ;;  %s399_s18 = smov 64  }
   0xf   :  { %328 = vmatpush3.bf16.msra.mxu0 %v368_v5  ;;  %338 = vmatpush3.bf16.msra.mxu1 %v371_v13  ;;  %v374_v16 = vld [vmem:[%s496_s2 + $0x18] sm:$0xff]   ;;  %v375_v17 = vld [vmem:[%s496_s2 + $0x20] sm:$0xff]   ;;  %v248_v19 = vunpack.c.l.s4 %v398_v18  ;;  %v376_v21 = vld [vmem:[%s496_s2 + $0x28] sm:$0xff]   ;;  %v251_v23 = vshrl.u32 %v250_v20, 7  ;;  %vm260_vm3 = vcmask 517120   ;;  %s383_s24 = scalar_lea.hbm %s498_s4, 16 }
  0x10   :  { %329 = vmatprep.subr.bf16.mxu0 %v396_v1  ;;  %339 = vmatprep.subr.bf16.mxu1 %v396_v1  ;;  %v377_v24 = vld [vmem:[%s496_s2 + $0x30] sm:$0xff]   ;;  %v378_v26 = vld [vmem:[%s496_s2 + $0x38] sm:$0xff]   ;;  %v287_v29 = vld [vmem:[%s497_s3] ss:$0 sm:$0xff]  ;;  %p384_p0 = scmp.ne.s32.totalorder %s498_s4, %s383_s24  ;;  %p387_p1 = scmp.lt.u32.totalorder %s383_s24, %s498_s4 }
  0x11   :  { %v249_v22 = vunpack.c.0.s8 %v248_v19  ;;  %v296_v41 = vld [vmem:[%s497_s3 + $0x1] ss:$0 sm:$0xff] }
  0x12   :  { %p389_p2 = pnand %p387_p1, %p384_p0 }
  0x13   :  { %330 = vmatpush3.bf16.msra.mxu0 %v369_v6  ;;  %340 = vmatpush3.bf16.msra.mxu1 %v372_v14  ;;  %v252_v25 = vsub.s32 %v249_v22, %v251_v23 }
  0x14   :  { %331 = vmatprep.subr.bf16.mxu0 %v396_v1  ;;  %341 = vmatprep.subr.bf16.mxu1 %v396_v1 }
  0x15   :  { %v253_v27 = vrot.slane %v429_v0, %v252_v25 }
  0x17   :  { %332 = vmatpush3.bf16.msra.mxu0 %v370_v7  ;;  %342 = vmatpush3.bf16.msra.mxu1 %v373_v15  ;;  %v254_v28 = vcombine.high %v253_v27, %v253_v27 }
  0x18   :  { %343 = vmatprep.subr.bf16.mxu1 %v396_v1 }
  0x19   :  { %255 = vrot.lane.b32.xlu0 %v254_v28, %s399_s18 }
  0x1b   :  { %344 = vmatpush3.bf16.msra.mxu1 %v374_v16 }
  0x1c   :  { %345 = vmatprep.subr.bf16.mxu1 %v396_v1 }
  0x1f   :  { %346 = vmatpush3.bf16.msra.mxu1 %v375_v17 }
  0x20   :  { %347 = vmatprep.subr.bf16.mxu1 %v396_v1 }
  0x23   :  { %348 = vmatpush3.bf16.msra.mxu1 %v376_v21 }
  0x24   :  { %349 = vmatprep.subr.bf16.mxu1 %v396_v1 }
  0x27   :  { %350 = vmatpush3.bf16.msra.mxu1 %v377_v24 }
  0x28   :  { %351 = vmatprep.subr.bf16.mxu1 %v396_v1 }
  0x2b   :  { %352 = vmatpush3.bf16.msra.mxu1 %v378_v26 }
  0x74   :  { %v22_v8 = vpop.permute.xlu0 %21 }
  0x75   :  { %v23_v9 = vrot.slane %v22_v8, 2 }
  0x77   :  { %v25_v10 = vsel %vm24_vm1, %v22_v8, %v23_v9 }
  0x78   :  { %v27_v11 = vadd.f32 %v25_v10, %v429_v0 }
  0x7a   :  { %v30_v12 = vpack.c.bf16 %v27_v11, %v27_v11 }
  0x7c   :  { %334 = vmatmul.mubr.msk.bf16.vlgmr.msra.gmra.mrb[0].mxu0 %vm85_vm2, %v30_v12 }
  0x8b   :  { %v256_v43 = vpop.permute.xlu0 %255 }
 0x14f   :  { %v123_v30 = vpop.f32.mrb[0].mxu0 }
 0x150   :  { %v124_v31 = vadd.f32 %v287_v29, %v123_v30  ;;  %v335_v32 = vpop.f32.mrb[1].mxu0 }
 0x151   :  { %v126_v33 = vpop.f32.mrb[2].mxu0 }
 0x152   :  { %v295_v34 = vmul.f32 -1.442695, %v124_v31  ;;  %v336_v35 = vpop.f32.mrb[3].mxu0 }
 0x154   :  { %379 = vpow2.f32 %v295_v34 }
 0x15e   :  { %v380_v36 = vpop.eup %379 }
 0x15f   :  { %v132_v37 = vadd.f32 1.0, %v380_v36 }
 0x161   :  { %381 = vrcp.f32 %v132_v37 }
 0x16b   :  { %v382_v38 = vpop.eup %381 }
 0x16c   :  { %v135_v39 = vmul.f32 %v382_v38, %v124_v31 }
 0x16e   :  { %v136_v40 = vpack.c.bf16 %v135_v39, %v135_v39 }
 0x170   :  { %354 = vmatmul.mubr.bf16.vlgmr.msra.gmra.mrb[0].mxu1 %v136_v40 }
 0x243   :  { %v241_v42 = vpop.f32.mrb[0].mxu1 }
 0x244   :  { %v242_v44 = vadd.f32 %v296_v41, %v241_v42  ;;  %v355_v45 = vpop.f32.mrb[1].mxu1 }
 0x245   :  { %v244_v46 = vpop.f32.mrb[2].mxu1 }
 0x246   :  { %v258_v47 = vsub.f32 %v242_v44, %v256_v43  ;;  %v356_v48 = vpop.f32.mrb[3].mxu1 }
 0x248   :  { %v259_v49 = vmul.f32 %v258_v47, %v258_v47 }
 0x24a   :  { %v261_v50 = vsel %vm260_vm3, %v259_v49, 0.0 }
 0x24b   :  { %262 = vadd.xlane.f32.xlu1 %v261_v50 }
 0x2d8   :  { %v263_v51 = vpop.xlane.xlu1 %262 }
 0x2d9   :  { %v264_v52 = vrot.slane %v263_v51, 4 }
 0x2db   :  { %v265_v53 = vadd.f32 %v264_v52, %v263_v51 }
 0x2dd   :  { %v266_v54 = vrot.slane %v265_v53, 2 }
 0x2df   :  { %v267_v55 = vadd.f32 %v266_v54, %v265_v53 }
 0x2e1   :  { %v268_v56 = vrot.slane %v267_v55, 1 }
 0x2e3   :  { %v269_v57 = vadd.f32 %v268_v56, %v267_v55 }
 0x2e5   :  { %357 = vpush %v269_v57 }
 0x316   :  { %s358_s3 = spop %357 }
 0x317   :  { %s271_s0 = smul.f32 0.0078125, %s358_s3 }
 0x319   :  { %273 = sst [smem:[#allocation2]] %s271_s0 }
 0x31a   :  { %392 = shalt.err (!%p389_p2)
}
 0x31b   :  { %s400_s29 = smov [#allocation2]  }
 0x31c   :  { %281 = dma.smem_to_hbm %s400_s29, 16, %s498_s4, [#allocation3]  }
 0x31d   :  { %393 = dma.done.wait [#allocation3], 16  }
 0x31e   :  { %394 = vsyncadd [#allocation3], 4294967280 }
 0x31f   :  { %285 = sfence }
 0x320   :  { %286 = vsyncpa [#allocation3], 1 }

</bundles_post_ra>
